<compile_context>
chip_gen: v5e
topology: v5e:2x2
jax: 0.10.0
libtpu: 0.0.40
codegen_flags: <defaults>
</compile_context>

<pallas_src>
import jax
import jax.numpy as jnp
from jax import lax
from jax.experimental import pallas as pl
from jax.experimental.pallas import tpu as pltpu


def prepare_weights(weights, weight_dtype=jnp.bfloat16):
    """One-time host-side weight prep: (L, out, in) -> (L, in, out), cast to stream dtype.

    Do this ONCE per set of parameters and cache the result; it must not sit on the
    per-forward path (it would double the weight HBM traffic of a bandwidth-bound kernel).
    # TODO(synk): on v7x, offer weight_dtype=float8_e4m3 with per-layer scales (needs
    # numerics validation); keep bf16 on v5e/v6e whose MXUs have no fp8 path.
    """
    return jnp.swapaxes(weights, 1, 2).astype(weight_dtype)


def mixed_module_forward(x, target, w_prepared, *, block_n=None, weight_buffers=2):
    """Fused forward of MixedModule.

    x:          (B, dim) float32                       -- data['data']
    target:     (B, dim) float32 in [0, 1]             -- data['target']
    w_prepared: (L, dim, dim) output of prepare_weights (layout (in, out), bf16),
                L = 4 * nlayers, layers in application order mlp0, mlp1, mlp2, mlploss.mlp.
    Returns the scalar BCE loss (f32).
    """
    B, dim = x.shape
    L, d_in, d_out = w_prepared.shape
    assert L >= 1 and d_in == dim and d_out == dim
    assert target.shape == (B, dim)

    act_dtype = w_prepared.dtype                    # activation ping-pong dtype (bf16)
    wbytes = jnp.dtype(act_dtype).itemsize

    # Per-generation VMEM capacity (v5e/v6e: 128 MiB, v7x: 64 MiB per TC).
    try:
        vmem_cap = int(pltpu.get_tpu_info().vmem_capacity_bytes)
    except Exception:  # pragma: no cover - conservative fallback
        vmem_cap = 64 * 2**20

    # Output(N)-dim weight tile: sized for DMA efficiency (~2-8 MiB per tile, smaller cap
    # on v7x), multiple of 256/128 for MXU/lane alignment; whole layer in one tile when
    # it already fits the cap (typical for dim <= ~1-2K).
    if block_n is None:
        tile_cap = 8 * 2**20 if vmem_cap > 96 * 2**20 else 4 * 2**20
        if dim <= 1024 or dim * dim * wbytes <= tile_cap:
            block_n = dim
        else:
            block_n = None
            for step in (256, 128):
                cand = (tile_cap // (dim * wbytes)) // step * step
                while cand >= step:
                    if dim % cand == 0:
                        block_n = int(cand)
                        break
                    cand -= step
                if block_n is not None:
                    break
            if block_n is None:
                block_n = dim                      # no lane-aligned divisor: single tile
    assert dim % block_n == 0
    n_tiles = dim // block_n
    assert n_tiles == 1 or block_n % 128 == 0, "tiled path needs lane-aligned block_n"

    # Lane-wide partial-loss accumulator width (avoids a cross-lane reduce per step).
    fold_w = 128 if block_n % 128 == 0 else block_n
    n_folds = block_n // fold_w
    inv_count = 1.0 / float(B * dim)               # BCELoss 'mean' denominator

    def kernel(x_ref, t_ref, w_ref, o_ref, act_ref, lsum_ref, dma_sem):
        l = pl.program_id(0)                       # layer index (sequential chain)
        n = pl.program_id(1)                       # output-column tile index
        last_layer = l == L - 1
        parity = l & 1

        @pl.when(jnp.logical_and(l == 0, n == 0))
        def _init():
            # One-time DMA of x (already in act dtype) into ping-pong buffer 0; x itself
            # never occupies a resident double-buffered VMEM input slot.
            cp = pltpu.make_async_copy(x_ref, act_ref.at[0], dma_sem)
            cp.start()
            cp.wait()
            lsum_ref[...] = jnp.zeros_like(lsum_ref)

        # Activation entering layer l (bf16) x weight tile (dim, TN) -> f32 MXU accumulation.
        lhs = act_ref[parity]                                          # (B, dim)
        y = jnp.dot(lhs, w_ref[...], preferred_element_type=jnp.float32)  # (B, TN) f32

        @pl.when(l < L - 1)
        def _store_act():
            col = pl.multiple_of(n * block_n, block_n)
            act_ref[1 - parity, :, pl.ds(col, block_n)] = y.astype(act_dtype)

        @pl.when(last_layer)
        def _epilogue():
            # Fused sigmoid + BCE over this output slice (PyTorch BCELoss log clamp -100).
            p = jax.nn.sigmoid(y)
            t = t_ref[...].astype(jnp.float32)
            log_p = jnp.maximum(jnp.log(p), -100.0)
            log_1mp = jnp.maximum(jnp.log1p(-p), -100.0)
            per = -(t * log_p + (1.0 - t) * log_1mp)                   # (B, TN) f32
            # Fold 128-lane groups with cheap VPU adds; no per-step cross-lane reduce.
            folded = per[:, 0:fold_w]
            for c in range(1, n_folds):
                folded = folded + per[:, c * fold_w:(c + 1) * fold_w]
            lsum_ref[...] += folded

        @pl.when(jnp.logical_and(last_layer, n == pl.num_programs(1) - 1))
        def _finalize():
            total = jnp.sum(lsum_ref[...])                             # single reduce at the end
            o_ref[...] = jnp.full((1, 1), total * inv_count, jnp.float32)

    # VMEM budget: weight tile multi-buffer + target double buffer + bf16 act ping-pong.
    est = (weight_buffers * dim * block_n * wbytes
           + 2 * B * block_n * 4
           + 2 * B * dim * wbytes
           + B * fold_w * 4
           + 64 * 1024)
    # Leave ~8 MiB headroom under the physical capacity (critical on v7x's 64 MiB/TC).
    vmem_limit = int(min(max(vmem_cap - 8 * 2**20, 32 * 2**20),
                         max(64 * 2**20, 2 * est)))

    cost = pl.CostEstimate(
        flops=2 * B * dim * dim * L,
        transcendentals=3 * B * dim,
        bytes_accessed=(L * dim * dim * wbytes      # weights streamed once
                        + B * dim * wbytes          # x read once
                        + B * dim * 4               # target read once (last layer only)
                        + 4),
    )

    w_index = lambda l, n: (l, 0, n)
    if weight_buffers == 2:
        # TODO(synk): sweep weight_buffers=3 (pl.Buffered) on v5e/v6e where 128 MiB VMEM
        # leaves room for deeper prefetch of the critical weight stream.
        w_spec = pl.BlockSpec((None, dim, block_n), w_index)
    else:
        w_spec = pl.BlockSpec((None, dim, block_n), w_index,
                              pipeline_mode=pl.Buffered(weight_buffers))

    # Target block index only advances during the last layer -> fetched once, not L times.
    t_spec = pl.BlockSpec((B, block_n), lambda l, n: (0, jnp.where(l == L - 1, n, 0)))

    out = pl.pallas_call(
        kernel,
        out_shape=jax.ShapeDtypeStruct((1, 1), jnp.float32),
        grid_spec=pltpu.PrefetchScalarGridSpec(
            num_scalar_prefetch=0,
            grid=(L, n_tiles),
            in_specs=[
                pl.BlockSpec(memory_space=pl.ANY),   # x: raw HBM ref, DMA'd once at init
                t_spec,                              # target tile (last layer only)
                w_spec,                              # one layer's (dim, TN) weight tile
            ],
            out_specs=pl.BlockSpec((1, 1), lambda l, n: (0, 0)),
            scratch_shapes=[
                pltpu.VMEM((2, B, dim), act_dtype),  # bf16 activation ping-pong
                pltpu.VMEM((B, fold_w), jnp.float32),  # lane-wide BCE partial sums
                pltpu.SemaphoreType.DMA(()),         # sem for the one-time x copy
            ],
        ),
        compiler_params=pltpu.CompilerParams(
            # Both axes are sequential: the layer chain is a true dependency and the
            # N axis reduces into shared activation scratch / the loss accumulator.
            # TODO(synk): on v7x add a leading "parallel" batch-tile axis (2 TCs) once B is
            # large enough that the kernel is MXU-bound rather than weight-bandwidth-bound.
            dimension_semantics=("arbitrary", "arbitrary"),
            vmem_limit_bytes=vmem_limit,
        ),
        cost_estimate=cost,
    )(x.astype(act_dtype), target, w_prepared)     # x cast is (B,dim)-sized, negligible
    return out[0, 0]


if __name__ == "__main__":
    # Small shapes consistent with MixedModule; L = 4 * nlayers linear layers total.
    batch, dim, nlayers = 8, 256, 2
    L = 4 * nlayers

    key = jax.random.PRNGKey(0)
    kx, kt, kw = jax.random.split(key, 3)
    x = jax.random.normal(kx, (batch, dim), dtype=jnp.float32)
    target = jax.random.uniform(kt, (batch, dim), dtype=jnp.float32)   # BCE target in [0,1)
    # Stacked PyTorch-layout (out, in) weights for mlp0/mlp1/mlp2/mlploss.mlp.
    weights = (jax.random.normal(kw, (L, dim, dim), dtype=jnp.float32)
               * (1.0 / jnp.sqrt(dim)))

    # One-time weight prep (transpose + bf16) -- cached, NOT on the per-forward path.
    w_prep = prepare_weights(weights)

    # Default picker -> block_n = dim (single tile); forced block_n=128 exercises the
    # multi-tile ping-pong / layer-gated target path.
    loss_auto = jax.block_until_ready(mixed_module_forward(x, target, w_prep))
    loss_tiled = jax.block_until_ready(mixed_module_forward(x, target, w_prep, block_n=128))

    # Pure-JAX reference of the PyTorch forward with the same bf16 weight / bf16
    # inter-layer activation rounding the kernel uses (f32 math otherwise).
    w_ref = weights.astype(jnp.bfloat16).astype(jnp.float32)
    a = x.astype(jnp.bfloat16).astype(jnp.float32)
    for i in range(L):
        y = jnp.dot(a, w_ref[i].T, precision=lax.Precision.HIGHEST)
        a = y.astype(jnp.bfloat16).astype(jnp.float32) if i < L - 1 else y
    p = jax.nn.sigmoid(a)
    log_p = jnp.maximum(jnp.log(p), -100.0)
    log_1mp = jnp.maximum(jnp.log1p(-p), -100.0)
    ref_loss = jnp.mean(-(target * log_p + (1.0 - target) * log_1mp))

    assert loss_auto.shape == () and loss_tiled.shape == ()
    assert bool(jnp.isfinite(loss_auto)) and bool(jnp.isfinite(loss_tiled))
    assert jnp.allclose(loss_auto, ref_loss, rtol=2e-2, atol=2e-2), (loss_auto, ref_loss)
    assert jnp.allclose(loss_tiled, ref_loss, rtol=2e-2, atol=2e-2), (loss_tiled, ref_loss)
    print("KERNEL_OK")
</pallas_src>

<mosaic_0001>
module attributes {stable_mosaic.version = 11 : i64} {
  func.func @kernel(%arg0: i32, %arg1: i32, %arg2: memref<8x256xbf16, #tpu.memory_space<any>>, %arg3: memref<8x256xf32, #tpu.memory_space<vmem>>, %arg4: memref<1x256x256xbf16, #tpu.memory_space<vmem>>, %arg5: memref<1x1xf32, #tpu.memory_space<vmem>>, %arg6: memref<2x8x256xbf16, #tpu.memory_space<vmem>>, %arg7: memref<8x128xf32, #tpu.memory_space<vmem>>, %arg8: memref<!tpu.dma_semaphore, #tpu.memory_space<semaphore_mem>>) attributes {dimension_semantics = [#tpu.dimension_semantics<arbitrary>, #tpu.dimension_semantics<arbitrary>], iteration_bounds = array<i64: 8, 1>, scalar_prefetch = 0 : i64, scratch_operands = 3 : i64, tpu.core_type = #tpu.core_type<tc>, window_params = [{}, {transform_indices = @transform_1, window_bounds = array<i64: 8, 256>}, {transform_indices = @transform_2, window_bounds = array<i64: 1, 256, 256>}, {pipeline_mode = #tpu.pipeline_mode<synchronous>, transform_indices = @transform_3, window_bounds = array<i64: 1, 1>}]} {
    %c7_i32 = arith.constant 7 : i32
    %0 = arith.cmpi eq, %arg0, %c7_i32 : i32
    %c1_i32 = arith.constant 1 : i32
    %1 = arith.andi %arg0, %c1_i32 : i32
    %c0_i32 = arith.constant 0 : i32
    %2 = arith.cmpi eq, %arg0, %c0_i32 : i32
    %c0_i32_0 = arith.constant 0 : i32
    %3 = arith.cmpi eq, %arg1, %c0_i32_0 : i32
    %4 = arith.andi %2, %3 : i1
    %5 = arith.extui %4 : i1 to i32
    %c0_i32_1 = arith.constant 0 : i32
    %6 = arith.cmpi ne, %5, %c0_i32_1 : i32
    scf.if %6 {
      %c0_i32_11 = arith.constant 0 : i32
      %c0_i32_12 = arith.constant 0 : i32
      %c0_i32_13 = arith.constant 0 : i32
      %22 = tpu.memref_slice %arg6[%c0_i32_11, %c0_i32_12, %c0_i32_13] : memref<2x8x256xbf16, #tpu.memory_space<vmem>> -> memref<1x8x256xbf16, #tpu.memory_space<vmem>>
      %23 = tpu.memref_squeeze %22 : memref<1x8x256xbf16, #tpu.memory_space<vmem>> -> memref<8x256xbf16, #tpu.memory_space<vmem>>
      tpu.enqueue_dma source(%arg2 : memref<8x256xbf16, #tpu.memory_space<any>>) target(%23 : memref<8x256xbf16, #tpu.memory_space<vmem>>) target_semaphore(%arg8 : memref<!tpu.dma_semaphore, #tpu.memory_space<semaphore_mem>>)
      %c0_i32_14 = arith.constant 0 : i32
      %c0_i32_15 = arith.constant 0 : i32
      %c0_i32_16 = arith.constant 0 : i32
      %24 = tpu.memref_slice %arg6[%c0_i32_14, %c0_i32_15, %c0_i32_16] : memref<2x8x256xbf16, #tpu.memory_space<vmem>> -> memref<1x8x256xbf16, #tpu.memory_space<vmem>>
      %25 = tpu.memref_squeeze %24 : memref<1x8x256xbf16, #tpu.memory_space<vmem>> -> memref<8x256xbf16, #tpu.memory_space<vmem>>
      tpu.wait_dma2 semaphore(%arg8 : memref<!tpu.dma_semaphore, #tpu.memory_space<semaphore_mem>>) src(%arg2 : memref<8x256xbf16, #tpu.memory_space<any>>) dst(%25 : memref<8x256xbf16, #tpu.memory_space<vmem>>)
      %cst_17 = arith.constant 0.000000e+00 : f32
      %26 = vector.broadcast %cst_17 : f32 to vector<8x128xf32>
      %c0_18 = arith.constant 0 : index
      %c0_19 = arith.constant 0 : index
      %27 = vector.load %arg7[%c0_18, %c0_19] : memref<8x128xf32, #tpu.memory_space<vmem>>, vector<8x128xf32>
      tpu.vector_store %arg7[%c0_18, %c0_19], %26 {strides = array<i32>} : memref<8x128xf32, #tpu.memory_space<vmem>>, vector<8x128xf32>,
    } else {
    }
    %7 = arith.index_cast %1 : i32 to index
    %c0 = arith.constant 0 : index
    %c0_2 = arith.constant 0 : index
    %8 = vector.load %arg6[%7, %c0, %c0_2] : memref<2x8x256xbf16, #tpu.memory_space<vmem>>, vector<1x8x256xbf16>
    %9 = vector.shape_cast %8 : vector<1x8x256xbf16> to vector<8x256xbf16>
    %c0_3 = arith.constant 0 : index
    %c0_4 = arith.constant 0 : index
    %c0_5 = arith.constant 0 : index
    %10 = vector.load %arg4[%c0_3, %c0_4, %c0_5] : memref<1x256x256xbf16, #tpu.memory_space<vmem>>, vector<1x256x256xbf16>
    %11 = vector.shape_cast %10 : vector<1x256x256xbf16> to vector<256x256xbf16>
    %cst = arith.constant dense<0.000000e+00> : vector<8x256xf32>
    %12 = tpu.matmul %9, %11, %cst {dimension_numbers = #tpu.dot_dimension_numbers<[1], [0], [0], [1], [0, 0, 1, 1], [], []>} : vector<8x256xbf16>, vector<256x256xbf16>, vector<8x256xf32> -> vector<8x256xf32>
    %c7_i32_6 = arith.constant 7 : i32
    %13 = arith.cmpi slt, %arg0, %c7_i32_6 : i32
    %14 = arith.extui %13 : i1 to i32
    %c0_i32_7 = arith.constant 0 : i32
    %15 = arith.cmpi ne, %14, %c0_i32_7 : i32
    scf.if %15 {
      %c256_i32 = arith.constant 256 : i32
      %22 = arith.muli %arg1, %c256_i32 : i32
      %23 = tpu.assume_multiple %22, 256 : i32
      %24 = arith.truncf %12 : vector<8x256xf32> to vector<8x256xbf16>
      %c1_i32_11 = arith.constant 1 : i32
      %25 = arith.subi %c1_i32_11, %1 : i32
      %26 = arith.index_cast %25 : i32 to index
      %c0_12 = arith.constant 0 : index
      %27 = arith.index_cast %23 : i32 to index
      %28 = vector.load %arg6[%26, %c0_12, %27] : memref<2x8x256xbf16, #tpu.memory_space<vmem>>, vector<1x8x256xbf16>
      %29 = vector.shape_cast %28 : vector<1x8x256xbf16> to vector<8x256xbf16>
      %30 = vector.shape_cast %24 : vector<8x256xbf16> to vector<1x8x256xbf16>
      tpu.vector_store %arg6[%26, %c0_12, %27], %30 {strides = array<i32>} : memref<2x8x256xbf16, #tpu.memory_space<vmem>>, vector<1x8x256xbf16>,
    } else {
    }
    %16 = arith.extui %0 : i1 to i32
    %c0_i32_8 = arith.constant 0 : i32
    %17 = arith.cmpi ne, %16, %c0_i32_8 : i32
    scf.if %17 {
      %22 = arith.negf %12 : vector<8x256xf32>
      %23 = math.exp %22 : vector<8x256xf32>
      %cst_11 = arith.constant 1.000000e+00 : f32
      %24 = vector.broadcast %cst_11 : f32 to vector<8x256xf32>
      %25 = arith.addf %24, %23 : vector<8x256xf32>
      %26 = arith.divf %24, %25 : vector<8x256xf32>
      %c0_12 = arith.constant 0 : index
      %c0_13 = arith.constant 0 : index
      %27 = vector.load %arg3[%c0_12, %c0_13] : memref<8x256xf32, #tpu.memory_space<vmem>>, vector<8x256xf32>
      %28 = math.log %26 : vector<8x256xf32>
      %cst_14 = arith.constant -1.000000e+02 : f32
      %29 = vector.broadcast %cst_14 : f32 to vector<8x256xf32>
      %30 = arith.maximumf %28, %29 : vector<8x256xf32>
      %cst_15 = arith.constant 0.000000e+00 : f32
      %31 = vector.broadcast %cst_15 : f32 to vector<8x256xf32>
      %32 = arith.subf %31, %26 : vector<8x256xf32>
      %33 = math.log1p %32 : vector<8x256xf32>
      %cst_16 = arith.constant -1.000000e+02 : f32
      %34 = vector.broadcast %cst_16 : f32 to vector<8x256xf32>
      %35 = arith.maximumf %33, %34 : vector<8x256xf32>
      %36 = arith.mulf %27, %30 : vector<8x256xf32>
      %cst_17 = arith.constant 1.000000e+00 : f32
      %37 = vector.broadcast %cst_17 : f32 to vector<8x256xf32>
      %38 = arith.subf %37, %27 : vector<8x256xf32>
      %39 = arith.mulf %38, %35 : vector<8x256xf32>
      %40 = arith.addf %36, %39 : vector<8x256xf32>
      %cst_18 = arith.constant 0.000000e+00 : f32
      %41 = vector.broadcast %cst_18 : f32 to vector<8x256xf32>
      %42 = arith.subf %41, %40 : vector<8x256xf32>
      %43 = vector.extract_strided_slice %42 {offsets = [0, 0], sizes = [8, 128], strides = [1, 1]} : vector<8x256xf32> to vector<8x128xf32>
      %44 = vector.extract_strided_slice %42 {offsets = [0, 128], sizes = [8, 128], strides = [1, 1]} : vector<8x256xf32> to vector<8x128xf32>
      %45 = arith.addf %43, %44 : vector<8x128xf32>
      %c0_19 = arith.constant 0 : index
      %c0_20 = arith.constant 0 : index
      %46 = vector.load %arg7[%c0_19, %c0_20] : memref<8x128xf32, #tpu.memory_space<vmem>>, vector<8x128xf32>
      %47 = arith.addf %46, %45 : vector<8x128xf32>
      %c0_21 = arith.constant 0 : index
      %c0_22 = arith.constant 0 : index
      %48 = vector.load %arg7[%c0_21, %c0_22] : memref<8x128xf32, #tpu.memory_space<vmem>>, vector<8x128xf32>
      tpu.vector_store %arg7[%c0_21, %c0_22], %47 {strides = array<i32>} : memref<8x128xf32, #tpu.memory_space<vmem>>, vector<8x128xf32>,
    } else {
    }
    %c0_i32_9 = arith.constant 0 : i32
    %18 = arith.cmpi eq, %arg1, %c0_i32_9 : i32
    %19 = arith.andi %0, %18 : i1
    %20 = arith.extui %19 : i1 to i32
    %c0_i32_10 = arith.constant 0 : i32
    %21 = arith.cmpi ne, %20, %c0_i32_10 : i32
    scf.if %21 {
      %c0_11 = arith.constant 0 : index
      %c0_12 = arith.constant 0 : index
      %22 = vector.load %arg7[%c0_11, %c0_12] : memref<8x128xf32, #tpu.memory_space<vmem>>, vector<8x128xf32>
      %23 = vector.shape_cast %22 : vector<8x128xf32> to vector<1x8x128xf32>
      %cst_13 = arith.constant dense<0.000000e+00> : vector<1xf32>
      %24 = vector.multi_reduction <add>, %23, %cst_13 [1, 2] : vector<1x8x128xf32> to vector<1xf32>
      %25 = vector.shape_cast %24 : vector<1xf32> to vector<1x1x1xf32>
      %26 = vector.extract %25[0, 0, 0] : f32 from vector<1x1x1xf32>
      %cst_14 = arith.constant 4.8828125E-4 : f32
      %27 = arith.mulf %26, %cst_14 : f32
      %28 = vector.broadcast %27 : f32 to vector<1x1xf32>
      %c0_15 = arith.constant 0 : index
      %c0_16 = arith.constant 0 : index
      %29 = vector.load %arg5[%c0_15, %c0_16] : memref<1x1xf32, #tpu.memory_space<vmem>>, vector<1x1xf32>
      tpu.vector_store %arg5[%c0_15, %c0_16], %28 {strides = array<i32>} : memref<1x1xf32, #tpu.memory_space<vmem>>, vector<1x1xf32>,
    } else {
    }
    return
  }
  func.func @transform_1(%arg0: i32, %arg1: i32) -> (i32, i32) {
    %c7_i32 = arith.constant 7 : i32
    %0 = arith.cmpi eq, %arg0, %c7_i32 : i32
    %c0_i32 = arith.constant 0 : i32
    %1 = arith.select %0, %arg1, %c0_i32 : i32
    %c0_i32_0 = arith.constant 0 : i32
    %c0_i32_1 = arith.constant 0 : i32
    return %c0_i32_0, %1 : i32, i32
  }
  func.func @transform_2(%arg0: i32, %arg1: i32) -> (i32, i32, i32) {
    %c0_i32 = arith.constant 0 : i32
    %c0_i32_0 = arith.constant 0 : i32
    return %arg0, %c0_i32, %arg1 : i32, i32, i32
  }
  func.func @transform_3(%arg0: i32, %arg1: i32) -> (i32, i32) {
    %c0_i32 = arith.constant 0 : i32
    %c0_i32_0 = arith.constant 0 : i32
    %c0_i32_1 = arith.constant 0 : i32
    return %c0_i32, %c0_i32_0 : i32, i32
  }
}

</mosaic_0001>

<bundles_post_ra>
// kernel: tpu_custom_call.1
= control target key start
LH: loop header
LB: loop body
LE: loop exit
PB: predicated region body
PF: predicated region fallthrough
CT: control target
= control target key end

     0   :  { %8 = vsyncpa [#allocation6], 0  ;;  %s1398_s0 = inlined_call_operand.hbm [shape: bf16[8,256], index: 0, kind: input, shape index: {}]   ;;  %s1399_s1 = inlined_call_operand.hbm [shape: f32[8,256], index: 1, kind: input, shape index: {}]   ;;  %s1400_s2 = inlined_call_operand.hbm [shape: bf16[8,256,256], index: 2, kind: input, shape index: {}]   ;;  %s1401_s3 = inlined_call_operand.hbm [shape: f32[1,1], index: 3, kind: output, shape index: {}]  }
   0x1   :  { %10 = vsyncpa [#allocation6 + $0x1], 0 }
   0x2   :  { %11 = vsyncpa [#allocation9], 0 }
   0x3   :  { %13 = vsyncpa [#allocation9 + $0x1], 0 }
   0x4   :  { %14 = vsyncpa [#allocation7], 0  ;;  %s1207_s12 = smov 0   ;;  %s1209_s13 = smov 0  }
   0x5   :  { %s1211_s14 = smov 0   ;;  %s1213_s15 = smov 0  }
   0x6   :  { %s1215_s16 = smov 0   ;;  %s1217_s17 = smov 0  }
   0x7 LB: > { %s723_s18 = sadd.s32 4294967295, %s1179_s17   ;;  %s71_s19 = sadd.s32 1, %s1167_s14  ;;  %s1179_s17 = sphi %s1217_s17, %s20_s17   ;;  %s1175_s16 = sphi %s1215_s16, %s1410_s16   ;;  %s1171_s15 = sphi %s1213_s15, %s1409_s15   ;;  %s1167_s14 = sphi %s1211_s14, %s1408_s14   ;;  %s1163_s13 = sphi %s1209_s13, %s1407_s13   ;;  %s1159_s12 = sphi %s1207_s12, %s1406_s12  }
   0x8   : > { %p78_p0 = scmp.ne.s32.totalorder %s1167_s14, %s1163_s13  ;;  %p79_p1 = scmp.eq.s32.totalorder %s1179_s17, 0 }
   0x9   : > { %p84_p2 = scmp.ne.s32.totalorder %s1163_s13, %s1159_s12  ;;  %p1243_p3 = scmp.eq.s32.totalorder %s723_s18, 0 }
   0xa   : > { %p80_p4 = por %p79_p1, %p78_p0  ;;  %p932_p6 = scmp.lt.s32.totalorder %s1179_s17, 8 }
   0xb   : > { %p1249_p5 = por %p1243_p3, %p84_p2  ;;  %s142_s24 = sshll.u32 %s1399_s1, 4  ;;  %s143_s24 = int_to_ptr.hbm [resolvable:$true] %s142_s24 }
   0xc   : > { %s1181_s25 = smov [#allocation5]   ;;  %p926_p7 = pnand %p932_p6, %p79_p1 }
   0xd   : > { %s144_s26 = sshll.u32 %s1181_s25, 4  ;;  %p1257_p8 = pnand %p932_p6, %p80_p4  ;;  %s145_s26 = int_to_ptr.vmem [resolvable:$true] %s144_s26 }
   0xe   : > { %p730_p9 = scmp.ge.s32.totalorder %s1179_s17, 1  ;;  %p173_p10 = scmp.lt.s32.totalorder %s1179_s17, 9 }
   0xf   : > { %928 = dma.hbm_to_vmem [thread:$0]  (!%p926_p7), %s143_s24, 256, %s145_s26, [#allocation6]  }
  0x10   : > { %s151_s28 = sand.u32 1, %s1167_s14   ;;  %p1264_p11 = pnand %p730_p9, %p173_p10 }
  0x11   : > { %s32_s30 = sadd.s32 1, %s1175_s16  ;;  %s727_s4 = sshll.u32 %s151_s28, 8 }
  0x12   : > { %p34_p12 = scmp.ge.s32.totalorder %s32_s30, 8  ;;  %s876_s5 = sshll.u32 %s1175_s16, 8 }
  0x13   : > { %s162_s8 = scalar_lea.hbm %s1400_s2, %s876_s5  ;;  %s155_s9 = scalar_lea.vmem [#allocation8], %s727_s4 }
  0x14   : > { %s1412_s30 = smov (%p34_p12, %s32_s30), 0  ;;  %s165_s10 = sshll.u32 %s155_s9, 4  ;;  %s166_s10 = int_to_ptr.vmem [resolvable:$true] %s165_s10 }
  0x15   : > { %s66_s11 = ssub.s32 %s1175_s16, %s1412_s30  ;;  %s163_s12 = sshll.u32 %s162_s8, 4  ;;  %s164_s12 = int_to_ptr.hbm [resolvable:$true] %s163_s12 }
  0x16   : > { %p69_p13 = scmp.eq.s32.totalorder %s66_s11, 0  ;;  %s152_s23 = scalar_lea.sflag [#allocation9], %s151_s28 }
  0x17   : > { %s1182_s24 = smov 128   ;;  %s1183_s25 = smov 8  }
  0x18   : > { %s1280_s22 = scalar_select %p69_p13, %s1167_s14, %s71_s19  }
  0x19   : > { %931 = dma.hbm_to_vmem [thread:$0]  (!%p1257_p8), %s164_s12, 4096, %s166_s10, %s152_s23, %s1182_s24, %s1182_s24, %s1183_s25  }
  0x1a   : > { %177 = sbr.rel (%p1264_p11) target bundleno = 485 (0x1e5), region = 28 }
  0x1f   : > { %1144 = dma.done.wait (%p1243_p3), [#allocation6], 256  }
  0x20   : > { %1146 = vsyncadd (%p1243_p3), [#allocation6], 4294967040  ;;  %s189_s26 = sand.u32 1, %s1163_s13  }
  0x21   : > { %s732_s4 = sshll.u32 %s189_s26, 8  ;;  %s190_s19 = scalar_lea.sflag [#allocation9], %s189_s26 }
  0x22   : > { %s1291_s5 = scalar_lea.vmem [#allocation8], %s732_s4 }
  0x23   : > { %1148 = dma.done.wait (%p1249_p5), %s190_s19, 4096  }
  0x24   : > { %1150 = vsyncadd (%p1249_p5), %s190_s19, 4294963200  ;;  %p219_p0 = scmp.eq.s32.totalorder %s1171_s15, 7  ;;  %s220_s27 = sand.u32 1, %s1171_s15 }
  0x25   : > { %p221_p1 = scmp.eq.s32.totalorder %s1171_s15, 0 }
  0x26   : > { %s234_s29 = sshll.u32 (%p221_p1), %s1398_s0, 4  ;;  %s1184_s6 = smov (%p221_p1), [#allocation2]   ;;  %s235_s29 = int_to_ptr.hbm [resolvable:$true] %s234_s29 }
  0x27   : > { %226 = sbr.rel (!%p221_p1) target bundleno = 47 (0x2f), region = 40  ;;  %s236_s7 = sshll.u32 (%p221_p1), %s1184_s6, 4  ;;  %s237_s7 = int_to_ptr.vmem [resolvable:$true] %s236_s7 }
  0x28   : > { %239 = dma.hbm_to_vmem [thread:$0]  (%p221_p1), %s235_s29, 128, %s237_s7, [#allocation4] }
  0x2c   : > { %1151 = dma.done.wait [#allocation4], 128 }
  0x2d   : > { %1152 = vsyncadd [#allocation4], 4294967168  ;;  %v1185_v0 = vmov 0.0  }
  0x2e   : > { %244 = vst [vmem:[#allocation3] sm:$0xff] %v1185_v0 }
  0x2f PF: > { %s878_s21 = sshll.u32 %s220_s27, 3  ;;  %p864_p2 = scmp.ge.s32.totalorder %s1171_s15, 7 }
  0x30   : > { %v794_v1 = vld [vmem:[%s1291_s5 + $0x70] sm:$0xf]  ;;  %v894_v2 = vld [vmem:[%s1291_s5 + $0x74] sm:$0xf0]  ;;  %v893_v6 = vld [vmem:[%s1291_s5 + $0x74] sm:$0xf] }
  0x31   : > { %v858_v3 = vld [vmem:[%s1291_s5 + $0xf0] sm:$0xf]  ;;  %v795_v4 = vor.u32 %v894_v2, %v794_v1  ;;  %v910_v5 = vld [vmem:[%s1291_s5 + $0xf4] sm:$0xf0]  ;;  %v796_v7 = vld [vmem:[%s1291_s5 + $0x78] sm:$0xf0] }
  0x32   : > { %v859_v8 = vor.u32 %v910_v5, %v858_v3  ;;  %v799_v9 = vor.u32 %v893_v6, %v796_v7  ;;  %v909_v10 = vld [vmem:[%s1291_s5 + $0xf4] sm:$0xf]  ;;  %v860_v11 = vld [vmem:[%s1291_s5 + $0xf8] sm:$0xf0]  ;;  %v786_v12 = vld [vmem:[%s1291_s5 + $0x60] sm:$0xf] }
  0x33   : > { %448 = vmatpush.bf16.msra.mxu0 %v795_v4  ;;  %v863_v13 = vor.u32 %v909_v10, %v860_v11  ;;  %v892_v14 = vld [vmem:[%s1291_s5 + $0x64] sm:$0xf0]  ;;  %v850_v15 = vld [vmem:[%s1291_s5 + $0xe0] sm:$0xf]  ;;  %v891_v19 = vld [vmem:[%s1291_s5 + $0x64] sm:$0xf] }
  0x34   : > { %v908_v16 = vld [vmem:[%s1291_s5 + $0xe4] sm:$0xf0]  ;;  %461 = vmatpush.bf16.msra.mxu1 %v859_v8  ;;  %474 = vmatpush.bf16.msra.mxu2 %v799_v9  ;;  %v787_v17 = vor.u32 %v892_v14, %v786_v12  ;;  %v788_v20 = vld [vmem:[%s1291_s5 + $0x68] sm:$0xf0]  ;;  %v907_v21 = vld [vmem:[%s1291_s5 + $0xe4] sm:$0xf] }
  0x35   : > { %v851_v18 = vor.u32 %v908_v16, %v850_v15  ;;  %487 = vmatpush.bf16.msra.mxu3 %v863_v13  ;;  %v791_v22 = vor.u32 %v891_v19, %v788_v20  ;;  %v852_v23 = vld [vmem:[%s1291_s5 + $0xe8] sm:$0xf0]  ;;  %v778_v24 = vld [vmem:[%s1291_s5 + $0x50] sm:$0xf]  ;;  %v890_v25 = vld [vmem:[%s1291_s5 + $0x54] sm:$0xf0] }
  0x36   : > { %v855_v26 = vor.u32 %v907_v21, %v852_v23  ;;  %v842_v27 = vld [vmem:[%s1291_s5 + $0xd0] sm:$0xf]  ;;  %v906_v28 = vld [vmem:[%s1291_s5 + $0xd4] sm:$0xf0]  ;;  %v889_v29 = vld [vmem:[%s1291_s5 + $0x54] sm:$0xf]  ;;  %v779_v30 = vor.u32 %v890_v25, %v778_v24 }
  0x37   : > { %449 = vmatpush.bf16.msra.mxu0 %v787_v17  ;;  %v780_v31 = vld [vmem:[%s1291_s5 + $0x58] sm:$0xf0]  ;;  %v905_v32 = vld [vmem:[%s1291_s5 + $0xd4] sm:$0xf]  ;;  %v843_v34 = vor.u32 %v906_v28, %v842_v27  ;;  %v770_v36 = vld [vmem:[%s1291_s5 + $0x40] sm:$0xf] }
  0x38   : > { %v844_v33 = vld [vmem:[%s1291_s5 + $0xd8] sm:$0xf0]  ;;  %462 = vmatpush.bf16.msra.mxu1 %v851_v18  ;;  %475 = vmatpush.bf16.msra.mxu2 %v791_v22  ;;  %v783_v35 = vor.u32 %v889_v29, %v780_v31  ;;  %v888_v37 = vld [vmem:[%s1291_s5 + $0x44] sm:$0xf0]  ;;  %v834_v38 = vld [vmem:[%s1291_s5 + $0xc0] sm:$0xf] }
  0x39   : > { %488 = vmatpush.bf16.msra.mxu3 %v855_v26  ;;  %v847_v39 = vor.u32 %v905_v32, %v844_v33  ;;  %v904_v40 = vld [vmem:[%s1291_s5 + $0xc4] sm:$0xf0]  ;;  %v887_v41 = vld [vmem:[%s1291_s5 + $0x44] sm:$0xf]  ;;  %v772_v42 = vld [vmem:[%s1291_s5 + $0x48] sm:$0xf0]  ;;  %v771_v45 = vor.u32 %v888_v37, %v770_v36 }
  0x3a   : > { %v903_v43 = vld [vmem:[%s1291_s5 + $0xc4] sm:$0xf]  ;;  %v836_v44 = vld [vmem:[%s1291_s5 + $0xc8] sm:$0xf0]  ;;  %v835_v46 = vor.u32 %v904_v40, %v834_v38  ;;  %v775_v47 = vor.u32 %v887_v41, %v772_v42  ;;  %v762_v48 = vld [vmem:[%s1291_s5 + $0x30] sm:$0xf] }
  0x3b   : > { %450 = vmatpush.bf16.msra.mxu0 %v779_v30  ;;  %v886_v49 = vld [vmem:[%s1291_s5 + $0x34] sm:$0xf0]  ;;  %v826_v50 = vld [vmem:[%s1291_s5 + $0xb0] sm:$0xf]  ;;  %v839_v51 = vor.u32 %v903_v43, %v836_v44  ;;  %v885_v53 = vld [vmem:[%s1291_s5 + $0x34] sm:$0xf] }
  0x3c   : > { %463 = vmatpush.bf16.msra.mxu1 %v843_v34  ;;  %476 = vmatpush.bf16.msra.mxu2 %v783_v35  ;;  %v902_v52 = vld [vmem:[%s1291_s5 + $0xb4] sm:$0xf0]  ;;  %v764_v54 = vld [vmem:[%s1291_s5 + $0x38] sm:$0xf0]  ;;  %v901_v55 = vld [vmem:[%s1291_s5 + $0xb4] sm:$0xf]  ;;  %v763_v57 = vor.u32 %v886_v49, %v762_v48 }
  0x3d   : > { %489 = vmatpush.bf16.msra.mxu3 %v847_v39  ;;  %v828_v56 = vld [vmem:[%s1291_s5 + $0xb8] sm:$0xf0]  ;;  %v827_v58 = vor.u32 %v902_v52, %v826_v50  ;;  %v767_v59 = vor.u32 %v885_v53, %v764_v54  ;;  %v754_v60 = vld [vmem:[%s1291_s5 + $0x20] sm:$0xf]  ;;  %v884_v61 = vld [vmem:[%s1291_s5 + $0x24] sm:$0xf0] }
  0x3e   : > { %v818_v62 = vld [vmem:[%s1291_s5 + $0xa0] sm:$0xf]  ;;  %v831_v63 = vor.u32 %v901_v55, %v828_v56  ;;  %v900_v0 = vld [vmem:[%s1291_s5 + $0xa4] sm:$0xf0]  ;;  %v883_v1 = vld [vmem:[%s1291_s5 + $0x24] sm:$0xf]  ;;  %v755_v5 = vor.u32 %v884_v61, %v754_v60 }
  0x3f   : > { %451 = vmatpush.bf16.msra.mxu0 %v771_v45  ;;  %v756_v2 = vld [vmem:[%s1291_s5 + $0x28] sm:$0xf0]  ;;  %v899_v3 = vld [vmem:[%s1291_s5 + $0xa4] sm:$0xf]  ;;  %v746_v6 = vld [vmem:[%s1291_s5 + $0x10] sm:$0xf]  ;;  %v819_v7 = vor.u32 %v900_v0, %v818_v62 }
  0x40   : > { %464 = vmatpush.bf16.msra.mxu1 %v835_v46  ;;  %477 = vmatpush.bf16.msra.mxu2 %v775_v47  ;;  %v820_v4 = vld [vmem:[%s1291_s5 + $0xa8] sm:$0xf0]  ;;  %v759_v8 = vor.u32 %v883_v1, %v756_v2  ;;  %v882_v9 = vld [vmem:[%s1291_s5 + $0x14] sm:$0xf0]  ;;  %v810_v10 = vld [vmem:[%s1291_s5 + $0x90] sm:$0xf] }
  0x41   : > { %490 = vmatpush.bf16.msra.mxu3 %v839_v51  ;;  %v898_v11 = vld [vmem:[%s1291_s5 + $0x94] sm:$0xf0]  ;;  %v823_v12 = vor.u32 %v899_v3, %v820_v4  ;;  %v881_v13 = vld [vmem:[%s1291_s5 + $0x14] sm:$0xf]  ;;  %v748_v14 = vld [vmem:[%s1291_s5 + $0x18] sm:$0xf0]  ;;  %v747_v17 = vor.u32 %v882_v9, %v746_v6 }
  0x42   : > { %v897_v15 = vld [vmem:[%s1291_s5 + $0x94] sm:$0xf]  ;;  %v812_v16 = vld [vmem:[%s1291_s5 + $0x98] sm:$0xf0]  ;;  %s247_s8 = scalar_lea.vmem [#allocation2], %s878_s21  ;;  %v811_v19 = vor.u32 %v898_v11, %v810_v10  ;;  %v751_v20 = vor.u32 %v881_v13, %v748_v14  ;;  %s506_s9 = ssub.s32 (!%p864_p2), 1, %s220_s27 }
  0x43   : > { %452 = vmatpush.bf16.msra.mxu0 %v763_v57  ;;  %v248_v18 = vld [vmem:[%s247_s8] sm:$0xff]  ;;  %v738_v21 = vld [vmem:[%s1291_s5] sm:$0xf]  ;;  %v815_v24 = vor.u32 %v897_v15, %v812_v16  ;;  %v879_v26 = vld [vmem:[%s1291_s5 + $0x4] sm:$0xf]  ;;  %s911_s10 = sshll.u32 (!%p864_p2), %s506_s9, 3 }
  0x44   : > { %465 = vmatpush.bf16.msra.mxu1 %v827_v58  ;;  %478 = vmatpush.bf16.msra.mxu2 %v767_v59  ;;  %v880_v22 = vld [vmem:[%s1291_s5 + $0x4] sm:$0xf0]  ;;  %v802_v23 = vld [vmem:[%s1291_s5 + $0x80] sm:$0xf]  ;;  %v740_v27 = vld [vmem:[%s1291_s5 + $0x8] sm:$0xf0]  ;;  %v282_v30 = vunpack.c.l.b16 %v248_v18  ;;  %v283_v32 = vunpack.c.h.b16 %v248_v18 }
  0x45   : > { %491 = vmatpush.bf16.msra.mxu3 %v831_v63  ;;  %v896_v25 = vld [vmem:[%s1291_s5 + $0x84] sm:$0xf0]  ;;  %v895_v28 = vld [vmem:[%s1291_s5 + $0x84] sm:$0xf]  ;;  %v804_v29 = vld [vmem:[%s1291_s5 + $0x88] sm:$0xf0]  ;;  %v739_v31 = vor.u32 %v880_v22, %v738_v21  ;;  %v743_v34 = vor.u32 %v879_v26, %v740_v27 }
  0x46   : > { %v803_v33 = vor.u32 %v896_v25, %v802_v23  ;;  %v807_v35 = vor.u32 %v895_v28, %v804_v29  ;;  %v284_v36 = vpack.c.b16 %v282_v30, %v282_v30  ;;  %v285_v37 = vpack.c.b16 %v283_v32, %v283_v32  ;;  %s512_s11 = scalar_lea.vmem (!%p864_p2), [#allocation2], %s911_s10 }
  0x47   : > { %453 = vmatpush.bf16.msra.mxu0 %v755_v5 }
  0x48   : > { %466 = vmatpush.bf16.msra.mxu1 %v819_v7  ;;  %479 = vmatpush.bf16.msra.mxu2 %v759_v8 }
  0x49   : > { %492 = vmatpush.bf16.msra.mxu3 %v823_v12 }
  0x4b   : > { %454 = vmatpush.bf16.msra.mxu0 %v747_v17 }
  0x4c   : > { %467 = vmatpush.bf16.msra.mxu1 %v811_v19  ;;  %480 = vmatpush.bf16.msra.mxu2 %v751_v20 }
  0x4d   : > { %493 = vmatpush.bf16.msra.mxu3 %v815_v24 }
  0x4f   : > { %455 = vmatpush.bf16.msra.mxu0 %v739_v31 }
  0x50   : > { %468 = vmatpush.bf16.msra.mxu1 %v803_v33  ;;  %481 = vmatpush.bf16.msra.mxu2 %v743_v34 }
  0x51   : > { %494 = vmatpush.bf16.msra.mxu3 %v807_v35 }
  0x52   : > { %456 = vmatmul.bf16.vlgmr.msra.gmra.mxu0 %v284_v36 }
  0x53   : > { %469 = vmatmul.bf16.vlgmr.msra.gmra.mxu1 %v285_v37  ;;  %482 = vmatmul.bf16.vlgmr.msra.gmra.mxu2 %v284_v36 }
  0x54   : > { %495 = vmatmul.bf16.vlgmr.msra.gmra.mxu3 %v285_v37 }
  0xcf   : > { %v457_v38 = vpop.f32.mrf.mxu0 }
  0xd0   : > { %v470_v39 = vpop.f32.mrf.mxu1 }
  0xd1   : > { %v471_v40 = vadd.f32 %v470_v39, %v457_v38 }
  0xd6   : > { %v483_v41 = vpop.f32.mrf.mxu2 }
  0xd7   : > { %v496_v42 = vpop.f32.mrf.mxu3  ;;  %v459_v43 = vpop.f32.mrf.mxu0 }
  0xd8   : > { %v497_v44 = vadd.f32 %v496_v42, %v483_v41  ;;  %v472_v45 = vpop.f32.mrf.mxu1 }
  0xdb   : > { %503 = sbr.rel (%p864_p2) target bundleno = 227 (0xe3), region = 48 }
  0xde   : > { %v485_v46 = vpop.f32.mrf.mxu2 }
  0xdf   : > { %v498_v47 = vpop.f32.mrf.mxu3 }
  0xe0   : > { %v505_v48 = vpack.c.bf16 %v497_v44, %v471_v40 }
  0xe2   : > { %513 = vst [vmem:[%s512_s11] sm:$0xff] %v505_v48 }
  0xe3 PF: > { %p867_p3 = scmp.ne.s32.totalorder %s1171_s15, 7 }
  0xe5   : > { %516 = sbr.rel (%p867_p3) target bundleno = 290 (0x122), region = 52 }
  0xea   : > { %v868_v49 = vmul.f32 -1.442695, %v471_v40  ;;  %v869_v50 = vmul.f32 -1.442695, %v497_v44  ;;  %v555_v25 = vld [vmem:[#allocation5] sm:$0xff]  ;;  %v556_v28 = vld [vmem:[#allocation5 + $0x8] sm:$0xff] }
  0xeb   : > { %v587_v35 = vsub.f32 1.0, %v555_v25  ;;  %v588_v37 = vsub.f32 1.0, %v556_v28 }
  0xec   : > { %991 = vpow2.f32 %v868_v49  ;;  %v596_v49 = vld [vmem:[#allocation3] sm:$0xff] }
  0xed   : > { %993 = vpow2.f32 %v869_v50 }
  0xf2   : > { %v992_v51 = vpop.eup %991 }
  0xf3   : > { %v994_v52 = vpop.eup %993  ;;  %v523_v53 = vadd.f32 1.0, %v992_v51 }
  0xf4   : > { %v524_v54 = vadd.f32 1.0, %v994_v52 }
  0xf5   : > { %995 = vrcp.f32 %v523_v53  ;;  %vm530_vm0 = vweird.f32 %v523_v53  ;;  %v536_v58 = vand.u32 2147483648, %v523_v53  ;;  %v534_v61 = vand.u32 2147483647, %v523_v53 }
  0xf6   : > { %997 = vrcp.f32 %v524_v54  ;;  %v551_v62 = vand.u32 2147483648, %v524_v54  ;;  %vm545_vm2 = vweird.f32 %v524_v54  ;;  %v549_v0 = vand.u32 2147483647, %v524_v54 }
  0xf7   : > { %v537_v2 = vor.u32 1.1754944e-38, %v536_v58  ;;  %vm535_vm5 = vcmp.eq.f32.partialorder %v534_v61, 8.507059e+37 }
  0xf8   : > { %v552_v5 = vor.u32 1.1754944e-38, %v551_v62  ;;  %vm550_vm7 = vcmp.eq.f32.partialorder %v549_v0, 8.507059e+37 }
  0xfb   : > { %v996_v55 = vpop.eup %995 }
  0xfc   : > { %v998_v56 = vpop.eup %997  ;;  %v526_v57 = vmul.f32 %v996_v55, %v523_v53  ;;  %vm531_vm1 = vweird.f32 %v996_v55 }
  0xfd   : > { %v541_v59 = vmul.f32 %v998_v56, %v524_v54  ;;  %vm546_vm3 = vweird.f32 %v998_v56  ;;  %vm532_vm4 = vmor %vm530_vm0, %vm531_vm1 }
  0xfe   : > { %v527_v60 = vsub.f32 1.0, %v526_v57  ;;  %vm547_vm6 = vmor %vm545_vm2, %vm546_vm3 }
  0xff   : > { %v542_v63 = vsub.f32 1.0, %v541_v59 }
 0x100   : > { %v528_v1 = vmul.f32 %v996_v55, %v527_v60 }
 0x101   : > { %v543_v3 = vmul.f32 %v998_v56, %v542_v63 }
 0x102   : > { %v529_v4 = vadd.f32 %v996_v55, %v528_v1 }
 0x103   : > { %v544_v6 = vadd.f32 %v998_v56, %v543_v3 }
 0x104   : > { %v533_v7 = vsel %vm532_vm4, %v996_v55, %v529_v4 }
 0x105   : > { %v538_v8 = vsel %vm535_vm5, %v537_v2, %v533_v7  ;;  %v548_v9 = vsel %vm547_vm6, %v998_v56, %v544_v6 }
 0x106   : > { %v553_v10 = vsel %vm550_vm7, %v552_v5, %v548_v9  ;;  %999 = vlog2.f32 %v538_v8  ;;  %v563_v11 = vsub.f32 0.0, %v538_v8 }
 0x107   : > { %1001 = vlog2.f32 %v553_v10  ;;  %v564_v12 = vsub.f32 0.0, %v553_v10 }
 0x108   : > { %v565_v13 = vadd.f32 1.0, %v563_v11  ;;  %v568_v14 = vmul.f32 -0.5, %v563_v11  ;;  %v571_v19 = vand.u32 2147483647, %v563_v11 }
 0x109   : > { %v574_v15 = vadd.f32 1.0, %v564_v12  ;;  %v577_v16 = vmul.f32 -0.5, %v564_v12  ;;  %v580_v23 = vand.u32 2147483647, %v564_v12 }
 0x10a   : > { %1003 = vlog2.f32 %v565_v13  ;;  %v569_v17 = vadd.f32 1.0, %v568_v14  ;;  %vm572_vm8 = vcmp.lt.f32.partialorder %v571_v19, 0.0004427343 }
 0x10b   : > { %1005 = vlog2.f32 %v574_v15  ;;  %v578_v20 = vadd.f32 1.0, %v577_v16  ;;  %vm581_vm9 = vcmp.lt.f32.partialorder %v580_v23, 0.0004427343 }
 0x10c   : > { %v1000_v18 = vpop.eup %999  ;;  %v570_v26 = vmul.f32 %v569_v17, %v563_v11 }
 0x10d   : > { %v1002_v21 = vpop.eup %1001  ;;  %v558_v22 = vmul.f32 0.6931472, %v1000_v18  ;;  %v579_v30 = vmul.f32 %v578_v20, %v564_v12 }
 0x10e   : > { %v560_v24 = vmul.f32 0.6931472, %v1002_v21 }
 0x10f   : > { %v561_v29 = vmax.f32 %v558_v22, -100.0 }
 0x110   : > { %v1004_v27 = vpop.eup %1003  ;;  %v562_v32 = vmax.f32 %v560_v24, -100.0 }
 0x111   : > { %v1006_v31 = vpop.eup %1005  ;;  %v567_v33 = vmul.f32 0.6931472, %v1004_v27  ;;  %v585_v40 = vmul.f32 %v561_v29, %v555_v25 }
 0x112   : > { %v576_v34 = vmul.f32 0.6931472, %v1006_v31  ;;  %v586_v42 = vmul.f32 %v562_v32, %v556_v28 }
 0x113   : > { %v573_v36 = vsel %vm572_vm8, %v570_v26, %v567_v33 }
 0x114   : > { %v582_v38 = vsel %vm581_vm9, %v579_v30, %v576_v34  ;;  %v583_v39 = vmax.f32 %v573_v36, -100.0 }
 0x115   : > { %v584_v41 = vmax.f32 %v582_v38, -100.0 }
 0x116   : > { %v589_v43 = vmul.f32 %v587_v35, %v583_v39 }
 0x117   : > { %v590_v44 = vmul.f32 %v588_v37, %v584_v41 }
 0x118   : > { %v591_v45 = vadd.f32 %v589_v43, %v585_v40 }
 0x119   : > { %v592_v46 = vadd.f32 %v590_v44, %v586_v42 }
 0x11a   : > { %v593_v47 = vsub.f32 0.0, %v591_v45 }
 0x11b   : > { %v594_v48 = vsub.f32 0.0, %v592_v46 }
 0x11d   : > { %v595_v50 = vadd.f32 %v594_v48, %v593_v47 }
 0x11f   : > { %v597_v51 = vadd.f32 %v596_v49, %v595_v50 }
 0x121   : > { %598 = vst [vmem:[#allocation3] sm:$0xff] %v597_v51 }
 0x122 PF: > { %602 = sbr.rel (!%p219_p0) target bundleno = 479 (0x1df), region = 56  ;;  %vm615_vm10 = vcmask (%p219_p0), 0  }
 0x128   : > { %v603_v52 = vld [vmem:[#allocation3] sm:$0xff] }
 0x129   : > { %604 = vadd.xlane.f32.xlu0 %v603_v52 }
 0x19c   : > { %v605_v53 = vpop.xlane.xlu0 %604 }
 0x19d   : > { %v606_v54 = vrot.slane %v605_v53, 4 }
 0x19f   : > { %v607_v55 = vadd.f32 %v606_v54, %v605_v53 }
 0x1a1   : > { %v608_v56 = vrot.slane %v607_v55, 2 }
 0x1a3   : > { %v609_v57 = vadd.f32 %v608_v56, %v607_v55 }
 0x1a5   : > { %v610_v58 = vrot.slane %v609_v57, 1 }
 0x1a7   : > { %v611_v59 = vadd.f32 %v610_v58, %v609_v57 }
 0x1a9   : > { %913 = vpush %v611_v59 }
 0x1da   : > { %s914_s12 = spop %913 }
 0x1db   : > { %s613_s23 = smul.f32 0.00048828125, %s914_s12 }
 0x1dd   : > { %v614_v60 = vstv %s613_s23 }
 0x1de   : > { %616 = vst.msk [vmem:[#allocation10] sm:$0x1] %vm615_vm10, %v614_v60 }
 0x1df PF: > { %p935_p4 = scmp.eq.s32.totalorder %s723_s18, 7  ;;  %s625_s25 = sshll.u32 %s1401_s3, 4  ;;  %s626_s25 = int_to_ptr.hbm [resolvable:$true] %s625_s25 }
 0x1e0   : > { %s1186_s26 = smov [#allocation10]  }
 0x1e1   : > { %s623_s4 = sshll.u32 %s1186_s26, 4  ;;  %s624_s4 = int_to_ptr.vmem [resolvable:$true] %s623_s4 }
 0x1e2   : > { %922 = dma.vmem_to_hbm [thread:$0]  (%p935_p4), %s624_s4, 16, %s626_s25, [#allocation7]  }
 0x1e3   : > { %1154 = dma.done.wait (%p935_p4), [#allocation7], 16  }
 0x1e4   : > { %1156 = vsyncadd (%p935_p4), [#allocation7], 4294967280 }
 0x1e5 PF: > { %s20_s17 = sadd.s32 1, %s1179_s17   ;;  %s1406_s12 = smov %s1163_s13 }
 0x1e6   : > { %p17_p5 = scmp.ge.s32.totalorder %s20_s17, 10   ;;  %s1407_s13 = smov %s1167_s14 }
 0x1e7   : > { %s1408_s14 = smov %s1280_s22  ;;  %s1409_s15 = smov %s1175_s16 }
 0x1e8   : > { %s1410_s16 = smov %s1412_s30  ;;  %19 = sbr.rel (!%p17_p5) target bundleno = 7 (0x7), region = 100 }
 0x1ed   :  { %639 = vsyncpa [#allocation6], 1 }
 0x1ee   :  { %641 = vsyncpa [#allocation6 + $0x1], 1 }
 0x1ef   :  { %642 = vsyncpa [#allocation9], 1 }
 0x1f0   :  { %644 = vsyncpa [#allocation9 + $0x1], 1 }
 0x1f1   :  { %645 = vsyncpa [#allocation7], 1 }
 0x1f2   :  { %647 = vsyncpa [#allocation7 + $0x1], 1 }
 0x1f3   :  { %648 = vsyncmov [#allocation4] }
 0x1f6   :  { %s649_s18 = vpop.sfrf %648 }
 0x1f7   :  { %p875_p6 = scmp.ne.s32.totalorder %s649_s18, 0 }
 0x1f9   :  { %653 = shalt.err (%p875_p6)  }

</bundles_post_ra>
